<compile_context>
chip_gen: v5e
topology: v5e:2x2
jax: 0.10.0
libtpu: 0.0.40
codegen_flags: <defaults>
</compile_context>

<pallas_src>
from functools import partial

import jax
import jax.numpy as jnp
from jax.experimental import pallas as pl
from jax.experimental.pallas import tpu as pltpu

_MIB = 1024 * 1024


def _round_up(a, b):
    return ((a + b - 1) // b) * b


def _vmem_capacity_bytes():
    try:
        return int(pltpu.get_tpu_info().vmem_capacity_bytes)
    except Exception:  # hardware query unavailable -> conservative (v7x-sized) default
        return 64 * _MIB


def _block_spec(shape, index_map, *, constant=False):
    """Default spec; single-buffer operands whose block never changes."""
    if constant and hasattr(pl, "Buffered"):
        try:
            return pl.BlockSpec(shape, index_map, pipeline_mode=pl.Buffered(1))
        except TypeError:  # Pallas version without pipeline_mode kwarg
            pass
    return pl.BlockSpec(shape, index_map)


# ----------------------------------------------------------------------------
# Kernels
# ----------------------------------------------------------------------------
def _pinv_kernel_single_k(x_ref, wp_ref, c_ref, o_ref):
    """K fits in one block: y = x @ Wp - c, f32 accumulation on the MXU."""
    y = jnp.dot(x_ref[...], wp_ref[...], preferred_element_type=jnp.float32)
    o_ref[...] = (y - c_ref[...]).astype(o_ref.dtype)


def _pinv_kernel_multi_k(x_ref, wp_ref, c_ref, o_ref, acc_ref):
    """K-tiled variant with a resident f32 accumulator (init/finalize via pl.when)."""
    k = pl.program_id(2)

    @pl.when(k == 0)
    def _():
        acc_ref[...] = jnp.zeros_like(acc_ref)

    acc_ref[...] += jnp.dot(x_ref[...], wp_ref[...],
                            preferred_element_type=jnp.float32)

    @pl.when(k == pl.num_programs(2) - 1)
    def _():
        o_ref[...] = (acc_ref[...] - c_ref[...]).astype(o_ref.dtype)


# ----------------------------------------------------------------------------
# Tile selection (bytes-based, generation-aware)
# ----------------------------------------------------------------------------
def _select_tiles(M, out_f, in_f_p, itemsize, vmem_cap):
    sub = 8 * max(1, 4 // itemsize)            # sublane multiple: 8 f32 / 16 bf16
    budget = vmem_cap * 7 // 10                # leave headroom for compiler scratch
    # v7x (<=64 MiB VMEM, ~3.2 TB/s HBM) wants more bytes/step to hide the
    # ~600-cycle grid-step overhead; v5e/v6e target 4 MiB streamed per step.
    stream_target = (6 if vmem_cap <= 96 * _MIB else 4) * _MIB

    tn = in_f_p
    tk = out_f

    def w_bufs(tk_, tn_):
        return 1 if (tk_ == out_f and tn_ == in_f_p) else 2  # constant -> 1 buffer

    def tile_bytes(tm_, tk_, tn_):
        x_b = 2 * tm_ * tk_ * itemsize                 # double-buffered activations
        o_b = 2 * tm_ * tn_ * itemsize                 # double-buffered output
        w_b = w_bufs(tk_, tn_) * tk_ * tn_ * itemsize  # pinv weight block(s)
        acc = tm_ * tn_ * 4                            # f32 accumulator (if K-tiled)
        return x_b + o_b + w_b + acc + 2 * tn_ * 4

    # M tile: stream ~stream_target bytes of x + out per grid step.
    tm = stream_target // ((out_f + in_f_p) * itemsize)
    tm = max(sub, min(_round_up(tm, sub), _round_up(M, sub)))

    # If over budget, shrink the weight's N tile first (keep tm large)...
    while tile_bytes(tm, tk, tn) > budget and tn > 128:
        tn = max(128, min(tn - 128, _round_up(tn // 2, 128)))

    # ...then split K, but only with an exact 128-multiple divisor of out_f
    # (a ragged contraction block would feed undefined data into the matmul).
    if tile_bytes(tm, tk, tn) > budget:
        cand = (out_f // 2) // 128 * 128
        while cand >= 128:
            if out_f % cand == 0 and tile_bytes(tm, cand, tn) <= budget:
                tk = cand
                break
            cand -= 128
    # TODO(synk): if out_f has no suitable 128-multiple divisor, K stays
    # un-tiled and we fall back to shrinking tm below.

    # ...and shrink tm only as a last resort.
    while tile_bytes(tm, tk, tn) > budget and tm > sub:
        tm = max(sub, min(tm - sub, _round_up(tm // 2, sub)))

    return tm, tk, tn, tile_bytes(tm, tk, tn)


# ----------------------------------------------------------------------------
# One-time preparation (SVD + bias fold + lane padding), hoisted per weight.
# ----------------------------------------------------------------------------
def prepare_pinv_adapter(adapter_weight, adapter_bias, dtype):
    """Returns (wp_padded (out_f, in_f_p), c_padded f32 (1, in_f_p), in_f)."""
    out_f, in_f = adapter_weight.shape
    w32 = adapter_weight.astype(jnp.float32)
    # torch.pinverse uses rcond=1e-15 * sigma_max; jnp.linalg.pinv's default
    # differs, so compute the pseudo-inverse explicitly via SVD.
    # TODO(synk): SVD has no Pallas equivalent; computed once here in plain JAX.
    u, s, vh = jnp.linalg.svd(w32, full_matrices=False)
    cutoff = 1e-15 * jnp.max(s)
    s_inv = jnp.where(s > cutoff, 1.0 / s, 0.0)
    w_pinv = (vh.T * s_inv[None, :]) @ u.T               # (in_f, out_f), f32

    wp = w_pinv.T.astype(dtype)                          # (out_f, in_f), MXU-ready
    # Fold the bias: (x - b) @ Wp == x @ Wp - (b @ Wp); keep the fold in f32.
    c = (adapter_bias.astype(jnp.float32) @ w_pinv.T).reshape(1, in_f)

    in_f_p = _round_up(max(in_f, 128), 128)              # lane-dense output columns
    if in_f_p != in_f:
        wp = jnp.pad(wp, ((0, 0), (0, in_f_p - in_f)))
        c = jnp.pad(c, ((0, 0), (0, in_f_p - in_f)))
    return wp, c, in_f


# ----------------------------------------------------------------------------
# Per-call apply (the Pallas kernel).
# ----------------------------------------------------------------------------
@partial(jax.jit, static_argnames=("in_f",))
def pinv_adapter_apply(x, wp_p, c_p, *, in_f):
    out_f, in_f_p = wp_p.shape
    assert x.shape[-1] == out_f

    lead = x.shape[:-1]
    x2d = x.reshape(-1, out_f)
    M = x2d.shape[0]

    itemsize = jnp.dtype(x.dtype).itemsize
    vmem_cap = _vmem_capacity_bytes()
    tm, tk, tn, est = _select_tiles(M, out_f, in_f_p, itemsize, vmem_cap)

    grid_m = pl.cdiv(M, tm)          # ragged final M block handled by Pallas (no pad)
    grid_n = pl.cdiv(in_f_p, tn)
    grid_k = out_f // tk             # tk always divides out_f exactly

    const_w = (grid_n == 1 and grid_k == 1)
    const_c = (grid_n == 1)

    in_specs = [
        _block_spec((tm, tk), lambda i, j, k: (i, k)),                 # streamed x
        _block_spec((tk, tn), lambda i, j, k: (k, j), constant=const_w),  # pinv(W).T
        _block_spec((1, tn), lambda i, j, k: (0, j), constant=const_c),   # folded bias
    ]
    out_spec = pl.BlockSpec((tm, tn), lambda i, j, k: (i, j))

    compiler_kwargs = dict(dimension_semantics=("parallel", "parallel", "arbitrary"))
    if est > 12 * _MIB:  # above the most conservative default scoped-VMEM limit
        compiler_kwargs["vmem_limit_bytes"] = int(
            min(max(est * 3 // 2, est + 4 * _MIB), vmem_cap * 9 // 10))

    if grid_k == 1:
        kernel, scratch = _pinv_kernel_single_k, []
    else:
        kernel, scratch = _pinv_kernel_multi_k, [pltpu.VMEM((tm, tn), jnp.float32)]

    out = pl.pallas_call(
        kernel,
        out_shape=jax.ShapeDtypeStruct((M, in_f_p), x.dtype),
        grid_spec=pltpu.PrefetchScalarGridSpec(
            num_scalar_prefetch=0,
            grid=(grid_m, grid_n, grid_k),
            in_specs=in_specs,
            out_specs=out_spec,
            scratch_shapes=scratch,
        ),
        compiler_params=pltpu.CompilerParams(**compiler_kwargs),
    )(x2d, wp_p, c_p)

    if in_f_p != in_f:
        out = out[:, :in_f]
    return out.reshape(*lead, in_f)


def pinv_adapter(x, adapter_weight, adapter_bias):
    """Convenience one-shot wrapper mirroring PInv_Adapter.forward."""
    wp_p, c_p, in_f = prepare_pinv_adapter(adapter_weight, adapter_bias, x.dtype)
    return pinv_adapter_apply(x, wp_p, c_p, in_f=in_f)


if __name__ == "__main__":
    # The adapter Linear maps in_features -> out_features; the PInv adapter maps
    # back, so x's last dim is out_features and the result's last dim is
    # in_features (128 here, already lane-dense).
    batch, seq = 2, 8
    in_features, out_features = 128, 256
    dtype = jnp.float32

    key = jax.random.PRNGKey(0)
    kx, kw, kb = jax.random.split(key, 3)
    x = jax.random.normal(kx, (batch, seq, out_features), dtype)
    bound = 1.0 / (in_features ** 0.5)
    adapter_weight = jax.random.uniform(kw, (out_features, in_features), dtype,
                                        -bound, bound)
    adapter_bias = jax.random.uniform(kb, (out_features,), dtype, -bound, bound)

    # One-time prep (SVD + bias fold) hoisted out of the per-call path.
    wp_p, c_p, in_f = prepare_pinv_adapter(adapter_weight, adapter_bias, dtype)
    y = pinv_adapter_apply(x, wp_p, c_p, in_f=in_f)
    y = jax.block_until_ready(y)

    # Pure-JAX reference mirroring the PyTorch forward: (x - b) @ pinv(W).T,
    # with the same rcond=1e-15 cutoff as torch.pinverse.
    w32 = adapter_weight.astype(jnp.float32)
    u, s, vh = jnp.linalg.svd(w32, full_matrices=False)
    s_inv = jnp.where(s > 1e-15 * jnp.max(s), 1.0 / s, 0.0)
    w_pinv_ref = ((vh.T * s_inv[None, :]) @ u.T).astype(dtype)   # (in_f, out_f)
    ref = jnp.dot((x - adapter_bias).reshape(-1, out_features), w_pinv_ref.T,
                  precision=jax.lax.Precision.HIGHEST)
    ref = ref.reshape(batch, seq, in_features)

    assert y.shape == (batch, seq, in_features)
    assert jnp.allclose(y, ref, atol=1e-3, rtol=1e-3), "mismatch vs reference"
    print("KERNEL_OK")
</pallas_src>

<mosaic_0001>
module attributes {stable_mosaic.version = 11 : i64} {
  func.func @_pinv_kernel_single_k(%arg0: i32, %arg1: i32, %arg2: i32, %arg3: memref<16x256xf32, #tpu.memory_space<vmem>>, %arg4: memref<256x128xf32, #tpu.memory_space<vmem>>, %arg5: memref<1x128xf32, #tpu.memory_space<vmem>>, %arg6: memref<16x128xf32, #tpu.memory_space<vmem>>) attributes {dimension_semantics = [#tpu.dimension_semantics<parallel>, #tpu.dimension_semantics<parallel>, #tpu.dimension_semantics<arbitrary>], iteration_bounds = array<i64: 1, 1, 1>, scalar_prefetch = 0 : i64, scratch_operands = 0 : i64, tpu.core_type = #tpu.core_type<tc>, window_params = [{transform_indices = @transform_0, window_bounds = array<i64: 16, 256>}, {pipeline_mode = #tpu.pipeline_mode<synchronous>, transform_indices = @transform_1, window_bounds = array<i64: 256, 128>}, {pipeline_mode = #tpu.pipeline_mode<synchronous>, transform_indices = @transform_2, window_bounds = array<i64: 1, 128>}, {transform_indices = @transform_3, window_bounds = array<i64: 16, 128>}]} {
    %c0 = arith.constant 0 : index
    %c0_0 = arith.constant 0 : index
    %0 = vector.load %arg3[%c0, %c0_0] : memref<16x256xf32, #tpu.memory_space<vmem>>, vector<16x256xf32>
    %c0_1 = arith.constant 0 : index
    %c0_2 = arith.constant 0 : index
    %1 = vector.load %arg4[%c0_1, %c0_2] : memref<256x128xf32, #tpu.memory_space<vmem>>, vector<256x128xf32>
    %cst = arith.constant dense<0.000000e+00> : vector<16x128xf32>
    %2 = tpu.matmul %0, %1, %cst {dimension_numbers = #tpu.dot_dimension_numbers<[1], [0], [0], [1], [0, 0, 1, 1], [], []>} : vector<16x256xf32>, vector<256x128xf32>, vector<16x128xf32> -> vector<16x128xf32>
    %c0_3 = arith.constant 0 : index
    %c0_4 = arith.constant 0 : index
    %3 = vector.load %arg5[%c0_3, %c0_4] : memref<1x128xf32, #tpu.memory_space<vmem>>, vector<1x128xf32>
    %4 = vector.broadcast %3 : vector<1x128xf32> to vector<16x128xf32>
    %5 = arith.subf %2, %4 : vector<16x128xf32>
    %c0_5 = arith.constant 0 : index
    %c0_6 = arith.constant 0 : index
    %6 = vector.load %arg6[%c0_5, %c0_6] : memref<16x128xf32, #tpu.memory_space<vmem>>, vector<16x128xf32>
    tpu.vector_store %arg6[%c0_5, %c0_6], %5 {strides = array<i32>} : memref<16x128xf32, #tpu.memory_space<vmem>>, vector<16x128xf32>,
    return
  }
  func.func @transform_0(%arg0: i32, %arg1: i32, %arg2: i32) -> (i32, i32) {
    %c0_i32 = arith.constant 0 : i32
    return %arg0, %arg2 : i32, i32
  }
  func.func @transform_1(%arg0: i32, %arg1: i32, %arg2: i32) -> (i32, i32) {
    %c0_i32 = arith.constant 0 : i32
    return %arg2, %arg1 : i32, i32
  }
  func.func @transform_2(%arg0: i32, %arg1: i32, %arg2: i32) -> (i32, i32) {
    %c0_i32 = arith.constant 0 : i32
    %c0_i32_0 = arith.constant 0 : i32
    return %c0_i32, %arg1 : i32, i32
  }
  func.func @transform_3(%arg0: i32, %arg1: i32, %arg2: i32) -> (i32, i32) {
    %c0_i32 = arith.constant 0 : i32
    return %arg0, %arg1 : i32, i32
  }
}

</mosaic_0001>

<bundles_post_ra>
// kernel: pinv_adapter_apply.1
= control target key start
LH: loop header
LB: loop body
LE: loop exit
PB: predicated region body
PF: predicated region fallthrough
CT: control target
= control target key end

     0   :  { %8 = vsyncpa [#allocation3], 0  ;;  %s320_s0 = inlined_call_operand.hbm [shape: f32[16,256], index: 0, kind: input, shape index: {}]   ;;  %s321_s1 = inlined_call_operand.hbm [shape: f32[256,128], index: 1, kind: input, shape index: {}]   ;;  %s322_s2 = inlined_call_operand.vmem [shape: f32[1,128], index: 2, kind: input, shape index: {}]   ;;  %s323_s3 = inlined_call_operand.hbm [shape: f32[16,128], index: 3, kind: output, shape index: {}]  }
   0x1   :  { %9 = vsyncpa [#allocation6], 0 }
   0x2   :  { %10 = vsyncpa [#allocation4], 0  ;;  %s15_s14 = sshll.u32 %s320_s0, 4  ;;  %s275_s15 = smov [#allocation2]   ;;  %s16_s14 = int_to_ptr.hbm [resolvable:$true] %s15_s14 }
   0x3   :  { %s17_s16 = sshll.u32 %s275_s15, 4  ;;  %s28_s19 = sshll.u32 %s321_s1, 4  ;;  %s18_s16 = int_to_ptr.vmem [resolvable:$true] %s17_s16  ;;  %s29_s19 = int_to_ptr.hbm [resolvable:$true] %s28_s19 }
   0x4   :  { %s276_s20 = smov 256   ;;  %s277_s21 = smov 16  }
   0x5   :  { %23 = dma.hbm_to_vmem [thread:$0]  %s16_s14, 512, %s18_s16, [#allocation3], %s276_s20, %s276_s20, %s277_s21  }
   0x6   :  { %s278_s22 = smov [#allocation5]   ;;  %s279_s24 = smov 128  }
   0x7   :  { %s30_s23 = sshll.u32 %s278_s22, 4  ;;  %s280_s25 = smov 8   ;;  %s31_s23 = int_to_ptr.vmem [resolvable:$true] %s30_s23 }
   0x8   :  { %36 = dma.hbm_to_vmem [thread:$0]  %s29_s19, 4096, %s31_s23, [#allocation6], %s279_s24, %s279_s24, %s280_s25  }
   0x9   :  { %269 = dma.done.wait [#allocation3], 512  }
   0xa   :  { %270 = vsyncadd [#allocation3], 4294966784 }
   0xb   :  { %271 = dma.done.wait [#allocation6], 4096  }
   0xc   :  { %272 = vsyncadd [#allocation6], 4294963200  ;;  %v66_v0 = vld [vmem:[#allocation5 + $0x78] sm:$0xff]  ;;  %v65_v2 = vld [vmem:[#allocation5 + $0x70] sm:$0xff]  ;;  %s281_s26 = smov [#allocation7]   ;;  %s143_s30 = sshll.u32 %s323_s3, 4  ;;  %s144_s30 = int_to_ptr.hbm [resolvable:$true] %s143_s30 }
   0xd   :  { %v82_v1 = vld [vmem:[#allocation5 + $0xf8] sm:$0xff]  ;;  %157 = vmatpush.msra.mxu2 %v66_v0  ;;  %v81_v3 = vld [vmem:[#allocation5 + $0xf0] sm:$0xff]  ;;  %v64_v4 = vld [vmem:[#allocation5 + $0x68] sm:$0xff]  ;;  %83 = vmatpush.msra.mxu0 %v66_v0  ;;  %s141_s27 = sshll.u32 %s281_s26, 4  ;;  %s142_s27 = int_to_ptr.vmem [resolvable:$true] %s141_s27 }
   0xe   :  { %173 = vmatpush.msra.mxu3 %v82_v1  ;;  %v80_v5 = vld [vmem:[#allocation5 + $0xe8] sm:$0xff]  ;;  %106 = vmatpush.msra.mxu1 %v82_v1  ;;  %v63_v6 = vld [vmem:[#allocation5 + $0x60] sm:$0xff]  ;;  %v62_v8 = vld [vmem:[#allocation5 + $0x58] sm:$0xff] }
   0xf   :  { %158 = vmatpush.msra.mxu2 %v65_v2  ;;  %v79_v7 = vld [vmem:[#allocation5 + $0xe0] sm:$0xff]  ;;  %84 = vmatpush.msra.mxu0 %v65_v2  ;;  %v78_v9 = vld [vmem:[#allocation5 + $0xd8] sm:$0xff]  ;;  %v61_v10 = vld [vmem:[#allocation5 + $0x50] sm:$0xff] }
  0x10   :  { %174 = vmatpush.msra.mxu3 %v81_v3  ;;  %107 = vmatpush.msra.mxu1 %v81_v3  ;;  %v77_v11 = vld [vmem:[#allocation5 + $0xd0] sm:$0xff]  ;;  %v60_v12 = vld [vmem:[#allocation5 + $0x48] sm:$0xff]  ;;  %v59_v14 = vld [vmem:[#allocation5 + $0x40] sm:$0xff] }
  0x11   :  { %159 = vmatpush.msra.mxu2 %v64_v4  ;;  %85 = vmatpush.msra.mxu0 %v64_v4  ;;  %v76_v13 = vld [vmem:[#allocation5 + $0xc8] sm:$0xff]  ;;  %v75_v15 = vld [vmem:[#allocation5 + $0xc0] sm:$0xff]  ;;  %v58_v16 = vld [vmem:[#allocation5 + $0x38] sm:$0xff] }
  0x12   :  { %175 = vmatpush.msra.mxu3 %v80_v5  ;;  %108 = vmatpush.msra.mxu1 %v80_v5  ;;  %v74_v17 = vld [vmem:[#allocation5 + $0xb8] sm:$0xff]  ;;  %v57_v18 = vld [vmem:[#allocation5 + $0x30] sm:$0xff]  ;;  %v56_v20 = vld [vmem:[#allocation5 + $0x28] sm:$0xff] }
  0x13   :  { %160 = vmatpush.msra.mxu2 %v63_v6  ;;  %86 = vmatpush.msra.mxu0 %v63_v6  ;;  %v73_v19 = vld [vmem:[#allocation5 + $0xb0] sm:$0xff]  ;;  %v72_v21 = vld [vmem:[#allocation5 + $0xa8] sm:$0xff]  ;;  %v55_v22 = vld [vmem:[#allocation5 + $0x20] sm:$0xff] }
  0x14   :  { %176 = vmatpush.msra.mxu3 %v79_v7  ;;  %109 = vmatpush.msra.mxu1 %v79_v7  ;;  %v71_v23 = vld [vmem:[#allocation5 + $0xa0] sm:$0xff]  ;;  %v54_v24 = vld [vmem:[#allocation5 + $0x18] sm:$0xff]  ;;  %v53_v26 = vld [vmem:[#allocation5 + $0x10] sm:$0xff] }
  0x15   :  { %161 = vmatpush.msra.mxu2 %v62_v8  ;;  %87 = vmatpush.msra.mxu0 %v62_v8  ;;  %v70_v25 = vld [vmem:[#allocation5 + $0x98] sm:$0xff]  ;;  %v69_v27 = vld [vmem:[#allocation5 + $0x90] sm:$0xff]  ;;  %v52_v28 = vld [vmem:[#allocation5 + $0x8] sm:$0xff] }
  0x16   :  { %177 = vmatpush.msra.mxu3 %v78_v9  ;;  %110 = vmatpush.msra.mxu1 %v78_v9  ;;  %v68_v29 = vld [vmem:[#allocation5 + $0x88] sm:$0xff]  ;;  %v51_v30 = vld [vmem:[#allocation5] sm:$0xff]  ;;  %v49_v32 = vld [vmem:[#allocation2 + $0x10] sm:$0xff] }
  0x17   :  { %162 = vmatpush.msra.mxu2 %v61_v10  ;;  %88 = vmatpush.msra.mxu0 %v61_v10  ;;  %v67_v31 = vld [vmem:[#allocation5 + $0x80] sm:$0xff]  ;;  %v50_v33 = vld [vmem:[#allocation2 + $0x18] sm:$0xff]  ;;  %v48_v35 = vld [vmem:[#allocation2 + $0x8] sm:$0xff] }
  0x18   :  { %178 = vmatpush.msra.mxu3 %v77_v11  ;;  %111 = vmatpush.msra.mxu1 %v77_v11  ;;  %v47_v34 = vld [vmem:[#allocation2] sm:$0xff] }
  0x19   :  { %163 = vmatpush.msra.mxu2 %v60_v12  ;;  %89 = vmatpush.msra.mxu0 %v60_v12  ;;  %v196_v36 = vld [vmem:[%s322_s2] ss:$0 sm:$0xff] }
  0x1a   :  { %179 = vmatpush.msra.mxu3 %v76_v13  ;;  %112 = vmatpush.msra.mxu1 %v76_v13 }
  0x1b   :  { %164 = vmatpush.msra.mxu2 %v59_v14  ;;  %90 = vmatpush.msra.mxu0 %v59_v14 }
  0x1c   :  { %180 = vmatpush.msra.mxu3 %v75_v15  ;;  %113 = vmatpush.msra.mxu1 %v75_v15 }
  0x1d   :  { %165 = vmatpush.msra.mxu2 %v58_v16  ;;  %91 = vmatpush.msra.mxu0 %v58_v16 }
  0x1e   :  { %181 = vmatpush.msra.mxu3 %v74_v17  ;;  %114 = vmatpush.msra.mxu1 %v74_v17 }
  0x1f   :  { %166 = vmatpush.msra.mxu2 %v57_v18  ;;  %92 = vmatpush.msra.mxu0 %v57_v18 }
  0x20   :  { %182 = vmatpush.msra.mxu3 %v73_v19  ;;  %115 = vmatpush.msra.mxu1 %v73_v19 }
  0x21   :  { %167 = vmatpush.msra.mxu2 %v56_v20  ;;  %93 = vmatpush.msra.mxu0 %v56_v20 }
  0x22   :  { %183 = vmatpush.msra.mxu3 %v72_v21  ;;  %116 = vmatpush.msra.mxu1 %v72_v21 }
  0x23   :  { %168 = vmatpush.msra.mxu2 %v55_v22  ;;  %94 = vmatpush.msra.mxu0 %v55_v22 }
  0x24   :  { %184 = vmatpush.msra.mxu3 %v71_v23  ;;  %117 = vmatpush.msra.mxu1 %v71_v23 }
  0x25   :  { %169 = vmatpush.msra.mxu2 %v54_v24  ;;  %95 = vmatpush.msra.mxu0 %v54_v24 }
  0x26   :  { %185 = vmatpush.msra.mxu3 %v70_v25  ;;  %118 = vmatpush.msra.mxu1 %v70_v25 }
  0x27   :  { %170 = vmatpush.msra.mxu2 %v53_v26  ;;  %96 = vmatpush.msra.mxu0 %v53_v26 }
  0x28   :  { %186 = vmatpush.msra.mxu3 %v69_v27  ;;  %119 = vmatpush.msra.mxu1 %v69_v27 }
  0x29   :  { %171 = vmatpush.msra.mxu2 %v52_v28  ;;  %97 = vmatpush.msra.mxu0 %v52_v28 }
  0x2a   :  { %187 = vmatpush.msra.mxu3 %v68_v29  ;;  %120 = vmatpush.msra.mxu1 %v68_v29 }
  0x2b   :  { %172 = vmatpush.msra.mxu2 %v51_v30  ;;  %98 = vmatpush.msra.mxu0 %v51_v30 }
  0x2c   :  { %188 = vmatpush.msra.mxu3 %v67_v31  ;;  %102 = vmatmul.f32.vlgmr.msra.gmra.mxu2 %v49_v32 }
  0x2d   :  { %125 = vmatmul.f32.vlgmr.msra.gmra.mxu3 %v50_v33  ;;  %121 = vmatpush.msra.mxu1 %v67_v31 }
  0x2e   :  { %99 = vmatmul.f32.vlgmr.msra.gmra.mxu0 %v47_v34  ;;  %122 = vmatmul.f32.vlgmr.msra.gmra.mxu1 %v48_v35 }
  0xab   :  { %v100_v37 = vpop.f32.mrf.mxu0  ;;  %v123_v38 = vpop.f32.mrf.mxu1 }
  0xac   :  { %v124_v39 = vadd.f32 %v123_v38, %v100_v37 }
  0xae   :  { %v133_v40 = vsub.f32 %v124_v39, %v196_v36 }
  0xaf   :  { %v103_v41 = vpop.f32.mrf.mxu2 }
  0xb0   :  { %v126_v42 = vpop.f32.mrf.mxu3  ;;  %135 = vst [vmem:[#allocation7] sm:$0xff] %v133_v40 }
  0xb1   :  { %v127_v43 = vadd.f32 %v126_v42, %v103_v41 }
  0xb3   :  { %v134_v44 = vsub.f32 %v127_v43, %v196_v36 }
  0xb5   :  { %136 = vst [vmem:[#allocation7 + $0x8] sm:$0xff] %v134_v44 }
  0xb6   :  { %149 = dma.vmem_to_hbm [thread:$0]  %s142_s27, 256, %s144_s30, [#allocation4], %s279_s24, %s279_s24, %s280_s25  }
  0xb7   :  { %273 = dma.done.wait [#allocation4], 256  }
  0xb8   :  { %274 = vsyncadd [#allocation4], 4294967040 }
  0xb9   :  { %154 = vsyncpa [#allocation3], 1 }
  0xba   :  { %155 = vsyncpa [#allocation6], 1 }
  0xbb   :  { %156 = vsyncpa [#allocation4], 1 }

</bundles_post_ra>
